<compile_context>
chip_gen: v6e
topology: v6e:2x2x1
jax: 0.10.0
libtpu: 0.0.40
codegen_flags: <defaults>
</compile_context>

<pallas_src>
import functools

import numpy as np
import jax
import jax.numpy as jnp
from jax import lax
from jax.experimental import pallas as pl
from jax.experimental.pallas import tpu as pltpu

# In the original module SAMPLE_RATE is a module-level constant; we pick a
# small value so the demo shapes stay small and the resampler is the identity.
SAMPLE_RATE = 512
PREEMPH_COEF = 0.97


def _round_up(a: int, b: int) -> int:
    return ((a + b - 1) // b) * b


def _preemph_kernel(x_ref, carry_ref, y_ref, *, coef):
    """y[n] = clamp(x[n] - coef * x[n-1], -1, 1) on a (BR, W) tile.

    Element (r, c) of the tile is cut sample block_start + r*W + c.  The
    previous sample is:
      * c >= 1        : one lane to the left            (XLU lane roll)
      * c == 0, r >= 1: last sample of the previous row (XLU sublane roll)
      * c == 0, r == 0: last sample of the previous block, read as a single
                        SMEM scalar (0.0 for block 0 -> lfilter's x[-1] = 0).
    Both rolls run on the XLU (free slots next to the loads/stores in this
    HBM-bound kernel); there is no lane-sparse halo DMA and no loop-carried
    state, so every grid step is independent.
    """
    cur = x_ref[...]                                    # (BR, W) f32
    rolled = pltpu.roll(cur, shift=1, axis=1)           # rolled[r, c]  = cur[r, c-1]
    shifted = pltpu.roll(rolled, shift=1, axis=0)       # shifted[r, 0] = cur[r-1, W-1]
    carry = carry_ref[pl.program_id(0)]                 # last sample of previous block (SMEM scalar)
    col = lax.broadcasted_iota(jnp.int32, cur.shape, 1)
    row = lax.broadcasted_iota(jnp.int32, cur.shape, 0)
    prev = jnp.where(col == 0, jnp.where(row == 0, carry, shifted), rolled)
    # torchaudio.functional.lfilter(..., clamp=True)
    y_ref[...] = jnp.clip(cur - coef * prev, -1.0, 1.0)


def preemphasis_cut_pallas(signal_1d: jax.Array, offset: int, num_frames: int,
                           coef: float = PREEMPH_COEF, *,
                           lane_width: int = 512, max_block_rows: int = 1024) -> jax.Array:
    """Random cut + pre-emphasis FIR, fused around a single Pallas pass.

    `offset`/`num_frames` are host-side ints mirroring
    torchaudio.load(frame_offset=..., num_frames=...).
    """
    assert lane_width % 128 == 0 and max_block_rows % 8 == 0
    x = signal_1d.astype(jnp.float32)
    T = int(num_frames)
    W = int(lane_width)                    # lane-dense last dim (multiple of 128)

    r0 = -(-T // W)                        # rows of real data
    rp = _round_up(r0, 8)                  # sublane-aligned rows (<= 7 padded rows)
    br = min(int(max_block_rows), rp)      # block rows: multiple of 8, block <= ~2 MiB
    n_blocks = -(-rp // br)                # last block may be partial (Pallas masks it)
    ch = br * W                            # samples per block

    # One fused XLA prep pass: cut + tail zero-pad + free reshape into a
    # lane-dense (rp, W) slab whose row-major order is sample order.
    cut = lax.dynamic_slice(x, (int(offset),), (T,))
    x2d = jnp.pad(cut, (0, rp * W - T)).reshape(rp, W)

    # Per-block carry = sample just before the block's first sample, gathered
    # straight from the full signal (n_blocks elements, not a full HBM pass).
    if n_blocks == 1:
        carries = jnp.zeros((1,), jnp.float32)
    else:
        j = jnp.arange(n_blocks, dtype=jnp.int32)
        pos = jnp.maximum(int(offset) - 1 + j * ch, 0)
        carries = jnp.where(j == 0, jnp.float32(0.0), x[pos])

    kernel = functools.partial(_preemph_kernel, coef=float(coef))
    y2d = pl.pallas_call(
        kernel,
        out_shape=jax.ShapeDtypeStruct((rp, W), jnp.float32),
        grid=(n_blocks,),
        in_specs=[
            pl.BlockSpec((br, W), lambda i: (i, 0)),              # signal tile (VMEM)
            pl.BlockSpec(memory_space=pltpu.MemorySpace.SMEM),    # per-block carries (SMEM)
        ],
        out_specs=pl.BlockSpec((br, W), lambda i: (i, 0)),
        compiler_params=pltpu.CompilerParams(
            dimension_semantics=("parallel",)),   # blocks independent -> megacore-shardable
    )(x2d, carries)

    # TODO(synk): input_output_aliases could let the output reuse x2d's buffer
    # (carries live in SMEM, so no RAW hazard) — saves allocation only, not traffic.
    y = y2d.reshape(rp * W)
    if rp * W != T:
        y = y[:T]                          # free when T == rp*W; tiny copy otherwise
    return y


def audio_read_forward(signal: jax.Array, duration: float, sr: int, *,
                       random_cut: float = 3.0, min_cut: float = 0.5,
                       preemph: float = 0.97, seed: int = 1):
    """Mirrors AudioRead.forward for the tensor-compute parts.

    `signal` stands in for the decoded audio file (torchaudio.load).  Returns
    (y, sr) like the module's (signal, sr, meta) minus the metadata.
    """
    # TODO(synk): torchaudio.load / file decode, cough-interval metadata
    # remapping and the cough-branch cut selection are host-side logic, not
    # kernel compute; only the deterministic no-cough branch is reproduced.
    rand = np.random.RandomState(seed=seed)
    total = int(signal.shape[0])
    if duration < 1.0 or random_cut <= 0:
        offset, num_frames = 0, total
    else:
        num_frames = int(random_cut * sr)
        offset = max(0, int(rand.rand() * (int(sr * duration) - num_frames - 1)))

    # resampling(): org_sr == SAMPLE_RATE -> identity (Resample not needed).
    sr_out = SAMPLE_RATE

    if preemph > 0.0:
        # Cut + pre-emphasis fused around one Pallas pass.
        y = preemphasis_cut_pallas(signal, offset, num_frames, coef=preemph)
    else:
        y = lax.dynamic_slice(signal.astype(jnp.float32), (offset,), (num_frames,))
    return y, sr_out


def _reference_numpy(signal: np.ndarray, duration: float, sr: int,
                     random_cut: float, preemph: float, seed: int):
    rand = np.random.RandomState(seed=seed)
    num_frames = int(random_cut * sr)
    offset = max(0, int(rand.rand() * (int(sr * duration) - num_frames - 1)))
    cut = signal[offset:offset + num_frames].astype(np.float32)
    prev = np.concatenate([[0.0], cut[:-1]]).astype(np.float32)
    y = cut - np.float32(preemph) * prev
    return np.clip(y, -1.0, 1.0)


if __name__ == "__main__":
    # Deterministic synthetic "audio file": 4.0 s at SAMPLE_RATE Hz.
    duration = 4.0
    sr = SAMPLE_RATE
    total = int(duration * sr)                       # 2048 samples
    key = jax.random.PRNGKey(0)
    signal = jax.random.uniform(key, (total,), dtype=jnp.float32,
                                minval=-1.0, maxval=1.0)

    y, out_sr = audio_read_forward(signal, duration, sr,
                                   random_cut=3.0, preemph=PREEMPH_COEF, seed=1)
    y = jax.block_until_ready(y)

    ref = _reference_numpy(np.asarray(signal), duration, sr,
                           random_cut=3.0, preemph=PREEMPH_COEF, seed=1)
    np.testing.assert_allclose(np.asarray(y), ref, rtol=1e-6, atol=1e-6)
    assert y.shape == (int(3.0 * sr),) and out_sr == SAMPLE_RATE

    # Extra check: force the multi-block path (per-block SMEM carries + grid > 1).
    rand = np.random.RandomState(seed=1)
    num_frames = int(3.0 * sr)
    offset = max(0, int(rand.rand() * (int(sr * duration) - num_frames - 1)))
    y_mb = preemphasis_cut_pallas(signal, offset, num_frames, coef=PREEMPH_COEF,
                                  lane_width=128, max_block_rows=8)
    np.testing.assert_allclose(np.asarray(jax.block_until_ready(y_mb)), ref,
                               rtol=1e-6, atol=1e-6)

    print("KERNEL_OK")
</pallas_src>

<mosaic_0001>
module attributes {stable_mosaic.version = 11 : i64} {
  func.func @_preemph_kernel(%arg0: i32, %arg1: memref<8x512xf32, #tpu.memory_space<vmem>>, %arg2: memref<1xf32, #tpu.memory_space<smem>>, %arg3: memref<8x512xf32, #tpu.memory_space<vmem>>) attributes {dimension_semantics = [#tpu.dimension_semantics<parallel>], iteration_bounds = array<i64: 1>, scalar_prefetch = 0 : i64, scratch_operands = 0 : i64, tpu.core_type = #tpu.core_type<tc>, window_params = [{transform_indices = @transform_0, window_bounds = array<i64: 8, 512>}, {transform_indices = @transform_1, window_bounds = array<i64: 1>}, {transform_indices = @transform_2, window_bounds = array<i64: 8, 512>}]} {
    %c0 = arith.constant 0 : index
    %c0_0 = arith.constant 0 : index
    %0 = vector.load %arg1[%c0, %c0_0] : memref<8x512xf32, #tpu.memory_space<vmem>>, vector<8x512xf32>
    %c1_i32 = arith.constant 1 : i32
    %1 = tpu.dynamic_rotate %0 by %c1_i32 dim 1 : vector<8x512xf32>, i32 -> vector<8x512xf32>
    %c1_i32_1 = arith.constant 1 : i32
    %2 = tpu.dynamic_rotate %1 by %c1_i32_1 dim 0 : vector<8x512xf32>, i32 -> vector<8x512xf32>
    %3 = arith.index_cast %arg0 : i32 to index
    %4 = memref.load %arg2[%3] : memref<1xf32, #tpu.memory_space<smem>>
    %5 = tpu.iota {dimensions = array<i32: 1>} : vector<8x512xi32>
    %6 = tpu.iota {dimensions = array<i32: 0>} : vector<8x512xi32>
    %c0_i32 = arith.constant 0 : i32
    %7 = vector.broadcast %c0_i32 : i32 to vector<8x512xi32>
    %8 = arith.cmpi eq, %5, %7 : vector<8x512xi32>
    %c0_i32_2 = arith.constant 0 : i32
    %9 = vector.broadcast %c0_i32_2 : i32 to vector<8x512xi32>
    %10 = arith.cmpi eq, %6, %9 : vector<8x512xi32>
    %11 = vector.broadcast %4 : f32 to vector<8x512xf32>
    %12 = arith.select %10, %11, %2 : vector<8x512xi1>, vector<8x512xf32>
    %13 = arith.select %8, %12, %1 : vector<8x512xi1>, vector<8x512xf32>
    %cst = arith.constant 9.700000e-01 : f32
    %14 = vector.broadcast %cst : f32 to vector<8x512xf32>
    %15 = arith.mulf %14, %13 : vector<8x512xf32>
    %16 = arith.subf %0, %15 : vector<8x512xf32>
    %cst_3 = arith.constant -1.000000e+00 : f32
    %cst_4 = arith.constant 1.000000e+00 : f32
    %17 = vector.broadcast %cst_3 : f32 to vector<8x512xf32>
    %18 = arith.maximumf %17, %16 : vector<8x512xf32>
    %19 = vector.broadcast %cst_4 : f32 to vector<8x512xf32>
    %20 = arith.minimumf %19, %18 : vector<8x512xf32>
    %c0_5 = arith.constant 0 : index
    %c0_6 = arith.constant 0 : index
    %21 = vector.load %arg3[%c0_5, %c0_6] : memref<8x512xf32, #tpu.memory_space<vmem>>, vector<8x512xf32>
    tpu.vector_store %arg3[%c0_5, %c0_6], %20 {strides = array<i32>} : memref<8x512xf32, #tpu.memory_space<vmem>>, vector<8x512xf32>,
    return
  }
  func.func @transform_0(%arg0: i32) -> (i32, i32) {
    %c0_i32 = arith.constant 0 : i32
    %c0_i32_0 = arith.constant 0 : i32
    return %arg0, %c0_i32 : i32, i32
  }
  func.func @transform_1(%arg0: i32) -> i32 {
    %c0_i32 = arith.constant 0 : i32
    %c0_i32_0 = arith.constant 0 : i32
    return %c0_i32 : i32
  }
  func.func @transform_2(%arg0: i32) -> (i32, i32) {
    %c0_i32 = arith.constant 0 : i32
    %c0_i32_0 = arith.constant 0 : i32
    return %arg0, %c0_i32 : i32, i32
  }
}

</mosaic_0001>

<bundles_post_ra>
// kernel: tpu_custom_call.1
= control target key start
LH: loop header
LB: loop body
LE: loop exit
PB: predicated region body
PF: predicated region fallthrough
CT: control target
= control target key end

     0   :  { %8 = vsyncpa [#allocation4], 0  ;;  %s181_s0 = inlined_call_operand.hbm [shape: f32[8,512], index: 0, kind: input, shape index: {}]   ;;  %s182_s1 = inlined_call_operand.<no memory space> [shape: f32[1], index: 1, kind: input, shape index: {}]   ;;  %s183_s2 = inlined_call_operand.hbm [shape: f32[8,512], index: 2, kind: output, shape index: {}]  }
   0x1   :  { %9 = vsyncpa [#allocation5], 0  ;;  %s154_s9 = smov [#allocation3]  }
   0x2   :  { %s16_s10 = sshll.u32 %s154_s9, 4  ;;  %s17_s10 = int_to_ptr.vmem [resolvable:$true] %s16_s10 }
   0x3   :  { %s118_s11 = scalar_lea.vmem %s17_s10, 512  ;;  %p123_p1 = scmp.lt.s32.totalorder %s17_s10, %s17_s10 }
   0x4   :  { %p119_p0 = scmp.ne.s32.totalorder %s17_s10, %s118_s11  ;;  %p124_p2 = scmp.lt.s32.totalorder %s118_s11, %s118_s11 }
   0x6   :  { %p125_p3 = por %p124_p2, %p123_p1 }
   0x8   :  { %p126_p4 = pnand %p125_p3, %p119_p0 }
   0xa   :  { %129 = shalt.err (!%p126_p4)
}
   0xb   :  { %19 = dma.hbm_to_vmem [thread:$0]  %s181_s0, 512, %s17_s10, [#allocation4]  }
   0xc   :  { %150 = dma.done.wait [#allocation4], 512  }
   0xd   :  { %151 = vsyncadd [#allocation4], 4294966784  ;;  %v26_v0 = vld [vmem:[#allocation3 + $0x8] sm:$0xff]  ;;  %v25_v1 = vld [vmem:[#allocation3] sm:$0xff]  ;;  %s155_s14 = smov 1   ;;  %v37_v4 = vlaneseq  ;;  %v59_v13 = vstv %s182_s1  ;;  %s156_s16 = smov [#allocation6]  }
   0xe   :  { %31 = vrot.lane.b32.xlu1 %v26_v0, %s155_s14  ;;  %29 = vrot.lane.b32.xlu0 %v25_v1, %s155_s14  ;;  %v27_v2 = vld [vmem:[#allocation3 + $0x10] sm:$0xff]  ;;  %v28_v3 = vld [vmem:[#allocation3 + $0x18] sm:$0xff]  ;;  %s94_s17 = sshll.u32 %s156_s16, 4  ;;  %s95_s17 = int_to_ptr.vmem [resolvable:$true] %s94_s17 }
   0xf   :  { %v38_v5 = vand.u32 127, %v37_v4  ;;  %v53_v9 = vshrl.u32 %v37_v4, 7  ;;  %s130_s1 = scalar_lea.vmem %s95_s17, 512  ;;  %p135_p6 = scmp.lt.s32.totalorder %s95_s17, %s95_s17 }
  0x10   :  { %p131_p5 = scmp.ne.s32.totalorder %s95_s17, %s130_s1  ;;  %p136_p7 = scmp.lt.s32.totalorder %s130_s1, %s130_s1 }
  0x11   :  { %vm39_vm0 = vcmp.lt.s32.totalorder %v38_v5, 1  ;;  %vm54_vm1 = vcmp.eq.s32.totalorder %v38_v5, 0  ;;  %vm58_vm2 = vcmp.eq.s32.totalorder %v53_v9, 0 }
  0x12   :  { %33 = vrot.lane.b32.xlu1 %v27_v2, %s155_s14  ;;  %35 = vrot.lane.b32.xlu0 %v28_v3, %s155_s14  ;;  %p137_p8 = por %p136_p7, %p135_p6 }
  0x14   :  { %p138_p9 = pnand %p137_p8, %p131_p5 }
  0x80   :  { %v32_v6 = vpop.permute.xlu1 %31  ;;  %v30_v7 = vpop.permute.xlu0 %29 }
  0x81   :  { %v42_v8 = vsel %vm39_vm0, %v30_v7, %v32_v6 }
  0x82   :  { %v69_v10 = vmul.f32 0.97, %v42_v8 }
  0x84   :  { %v73_v11 = vsub.f32 %v26_v0, %v69_v10  ;;  %v34_v12 = vpop.permute.xlu1 %33  ;;  %v36_v14 = vpop.permute.xlu0 %35 }
  0x85   :  { %v41_v15 = vsel %vm39_vm0, %v32_v6, %v34_v12  ;;  %v40_v16 = vsel %vm39_vm0, %v34_v12, %v36_v14  ;;  %v43_v17 = vsel %vm39_vm0, %v36_v14, %v30_v7 }
  0x86   :  { %v104_v18 = vclamps-f32 %v73_v11, 1.0  ;;  %v70_v19 = vmul.f32 0.97, %v41_v15  ;;  %v44_v20 = vrot.slane %v43_v17, 7  ;;  %v71_v21 = vmul.f32 0.97, %v40_v16 }
  0x88   :  { %85 = vst [vmem:[#allocation6 + $0x8] sm:$0xff] %v104_v18  ;;  %v74_v22 = vsub.f32 %v27_v2, %v70_v19  ;;  %v60_v23 = vsel %vm58_vm2, %v59_v13, %v44_v20  ;;  %v75_v24 = vsub.f32 %v28_v3, %v71_v21 }
  0x89   :  { %v64_v25 = vsel %vm54_vm1, %v60_v23, %v43_v17 }
  0x8a   :  { %v105_v26 = vclamps-f32 %v74_v22, 1.0  ;;  %v68_v27 = vmul.f32 0.97, %v64_v25  ;;  %v106_v28 = vclamps-f32 %v75_v24, 1.0 }
  0x8c   :  { %86 = vst [vmem:[#allocation6 + $0x10] sm:$0xff] %v105_v26  ;;  %v72_v29 = vsub.f32 %v25_v1, %v68_v27  ;;  %87 = vst [vmem:[#allocation6 + $0x18] sm:$0xff] %v106_v28 }
  0x8e   :  { %v103_v30 = vclamps-f32 %v72_v29, 1.0 }
  0x90   :  { %84 = vst [vmem:[#allocation6] sm:$0xff] %v103_v30 }
  0x91   :  { %141 = shalt.err (!%p138_p9)
}
  0x92   :  { %97 = dma.vmem_to_hbm [thread:$0]  %s95_s17, 512, %s183_s2, [#allocation5]  }
  0x93   :  { %152 = dma.done.wait [#allocation5], 512  }
  0x94   :  { %153 = vsyncadd [#allocation5], 4294966784 }
  0x95   :  { %101 = vsyncpa [#allocation4], 1 }
  0x96   :  { %102 = vsyncpa [#allocation5], 1 }

</bundles_post_ra>
